<compile_context>
chip_gen: v7x
topology: tpu7x:2x2x1
jax: 0.10.0
libtpu: 0.0.40
codegen_flags: <defaults>
</compile_context>

<pallas_src>
import jax
import jax.numpy as jnp
from jax.experimental import pallas as pl
from jax.experimental.pallas import tpu as pltpu


def _round_up(x, m):
    return (x + m - 1) // m * m


def _pad_to(x, shape):
    pads = [(0, s - d) for d, s in zip(x.shape, shape)]
    if all(p == (0, 0) for p in pads):
        return x
    return jnp.pad(x, pads)


# ----------------------------------------------------------------------------
# Kernel 1: fused image branch.
#   feat       = relu(img_flat @ W_resnet + b_resnet)      (once, VMEM scratch, bf16)
#   img_logits = feat @ W_cls_img[:, v_tile] + b_cls        (per vocab tile)
# Grid: (v_tiles,) -- must stay "arbitrary" so the feat scratch computed at v==0
# is valid for every vocab tile.
# ----------------------------------------------------------------------------
def _img_branch_kernel(x_ref, wr_ref, br_ref, wi_ref, bc_ref, o_ref, feat_sc):
    @pl.when(pl.program_id(0) == 0)
    def _():
        f = jnp.dot(x_ref[...], wr_ref[...], preferred_element_type=jnp.float32)
        feat_sc[...] = jnp.maximum(f + br_ref[...], 0.0).astype(feat_sc.dtype)

    y = jnp.dot(feat_sc[...], wi_ref[...], preferred_element_type=jnp.float32)
    o_ref[...] = (y + bc_ref[...]).astype(o_ref.dtype)


def image_branch(img_flat, w_resnet, b_resnet, w_cls_img, b_cls, *, tv):
    """img_flat (Bp,K) bf16, w_resnet (K,IMGp) bf16, b_resnet (1,IMGp) f32,
    w_cls_img (IMGp,Vp) bf16, b_cls (1,Vp) f32 -> img_logits (Bp,Vp) f32."""
    Bp, K = img_flat.shape
    IMGp = w_resnet.shape[1]
    Vp = w_cls_img.shape[1]
    return pl.pallas_call(
        _img_branch_kernel,
        out_shape=jax.ShapeDtypeStruct((Bp, Vp), jnp.float32),
        grid=(Vp // tv,),
        in_specs=[
            pl.BlockSpec((Bp, K), lambda v: (0, 0)),       # resident
            pl.BlockSpec((K, IMGp), lambda v: (0, 0)),     # resident
            pl.BlockSpec((1, IMGp), lambda v: (0, 0)),
            pl.BlockSpec((IMGp, tv), lambda v: (0, v)),    # streamed vocab tile
            pl.BlockSpec((1, tv), lambda v: (0, v)),
        ],
        out_specs=pl.BlockSpec((Bp, tv), lambda v: (0, v)),
        scratch_shapes=[pltpu.VMEM((Bp, IMGp), jnp.bfloat16)],
        compiler_params=pltpu.CompilerParams(
            dimension_semantics=("arbitrary",),
            vmem_limit_bytes=48 * 1024 * 1024),
    )(img_flat, w_resnet, b_resnet, w_cls_img, b_cls)


# ----------------------------------------------------------------------------
# Kernel 2: fused text-encoder (GPT2 stub) + classifier.
# Grid: (B, t_tiles, v_tiles).  Each block maps to one image; the (1, tv)
# img_logits tile is added broadcast over the token rows.  The tanh-projected
# text features for a (b, t) row block are computed ONCE (at v == 0) into a
# bf16 VMEM scratch and reused for every vocab tile.
# NOTE: correctness of txt_sc relies on the vocab axis (2) being the innermost,
# sequentially iterated ("arbitrary") grid axis.  Do not reorder the grid or
# mark axis 2 "parallel".
# ----------------------------------------------------------------------------
def _text_cls_kernel(emb_ref, il_ref, wg_ref, bg_ref, wt_ref, o_ref, txt_sc):
    # emb (1,tt,H) bf16 | il (1,1,tv) f32 | wg (H,H) bf16 | bg (1,H) f32
    # wt (H,tv) bf16    | out (1,tt,tv) f32 | txt_sc (tt,H) bf16
    @pl.when(pl.program_id(2) == 0)
    def _():
        h = jnp.dot(emb_ref[0], wg_ref[...], preferred_element_type=jnp.float32)
        txt_sc[...] = jnp.tanh(h + bg_ref[...]).astype(txt_sc.dtype)  # f32 epilogue

    txt = jnp.dot(txt_sc[...], wt_ref[...], preferred_element_type=jnp.float32)
    o_ref[0] = (txt + il_ref[0]).astype(o_ref.dtype)


def text_and_classifier(emb, img_logits3, w_gpt2, b_gpt2, w_cls_txt, *, tt, tv):
    """emb (B,Tp,H) bf16, img_logits3 (B,1,Vp) f32, w_gpt2 (H,H) bf16,
    b_gpt2 (1,H) f32, w_cls_txt (H,Vp) bf16 -> logits (B,Tp,Vp) f32."""
    B, Tp, H = emb.shape
    Vp = w_cls_txt.shape[1]
    return pl.pallas_call(
        _text_cls_kernel,
        out_shape=jax.ShapeDtypeStruct((B, Tp, Vp), jnp.float32),
        grid=(B, Tp // tt, Vp // tv),
        in_specs=[
            pl.BlockSpec((1, tt, H), lambda b, t, v: (b, t, 0)),
            pl.BlockSpec((1, 1, tv), lambda b, t, v: (b, 0, v)),
            pl.BlockSpec((H, H), lambda b, t, v: (0, 0)),   # resident weights
            pl.BlockSpec((1, H), lambda b, t, v: (0, 0)),
            pl.BlockSpec((H, tv), lambda b, t, v: (0, v)),  # streamed vocab tile
        ],
        out_specs=pl.BlockSpec((1, tt, tv), lambda b, t, v: (b, t, v)),
        scratch_shapes=[pltpu.VMEM((tt, H), jnp.bfloat16)],
        compiler_params=pltpu.CompilerParams(
            dimension_semantics=("parallel", "parallel", "arbitrary"),
            vmem_limit_bytes=48 * 1024 * 1024),
    )(emb, img_logits3, w_gpt2, b_gpt2, w_cls_txt)


# ----------------------------------------------------------------------------
# VQAModel forward (JAX glue around the Pallas kernels).
# ----------------------------------------------------------------------------
def vqa_forward(params, images, question, *, t_tile=128, v_tile=512):
    bf16 = jnp.bfloat16
    B = images.shape[0]
    T = question.shape[1]
    H = params["w_gpt2"].shape[0]
    IMG = params["w_cls_img"].shape[0]
    V = params["w_cls_img"].shape[1]
    K_img = images[0].size

    # --- tiling / padding geometry --------------------------------------------
    B_pad = _round_up(B, 8)
    IMG_pad = _round_up(IMG, 128)                # lane-dense feature / img-K dim
    tv = min(v_tile, _round_up(V, 128))          # vocab tile: multiple of 128
    V_pad = _round_up(V, tv)
    tt = min(t_tile, _round_up(T, 8))            # token-row tile: multiple of 8
    T_pad = _round_up(T, tt)

    # --- image branch: fused ResNet50-stub linear+ReLU + per-image classifier ---
    img_flat = _pad_to(images.reshape(B, -1).astype(bf16), (B_pad, K_img))
    w_resnet = _pad_to(params["w_resnet"], (K_img, IMG_pad)).astype(bf16)
    b_resnet = _pad_to(params["b_resnet"], (1, IMG_pad))
    w_cls_img = _pad_to(params["w_cls_img"], (IMG_pad, V_pad)).astype(bf16)
    b_cls = _pad_to(params["b_cls"], (1, V_pad))
    img_logits = image_branch(img_flat, w_resnet, b_resnet,
                              w_cls_img, b_cls, tv=tv)          # (B_pad, V_pad) f32

    # --- text branch: embedding gather (plain-JAX glue) + fused kernel ----------
    emb = params["embedding"][question]                          # (B, T, H)
    emb = _pad_to(emb.astype(bf16), (B, T_pad, H))
    w_gpt2 = params["w_gpt2"].astype(bf16)
    b_gpt2 = params["b_gpt2"]
    w_cls_txt = _pad_to(params["w_cls_txt"], (H, V_pad)).astype(bf16)
    img_logits3 = img_logits[:B].reshape(B, 1, V_pad)            # per-image tile
    logits = text_and_classifier(emb, img_logits3, w_gpt2, b_gpt2,
                                 w_cls_txt, tt=tt, tv=tv)        # (B, T_pad, V_pad)
    return logits[:, :T, :V]


def make_params(key, img_in, img_dim, hidden, vocab):
    ks = jax.random.split(key, 6)
    scale = 0.02
    return {
        "w_resnet": scale * jax.random.normal(ks[0], (img_in, img_dim), jnp.float32),
        "b_resnet": jnp.zeros((1, img_dim), jnp.float32),
        "embedding": scale * jax.random.normal(ks[1], (vocab, hidden), jnp.float32),
        "w_gpt2": scale * jax.random.normal(ks[2], (hidden, hidden), jnp.float32),
        "b_gpt2": jnp.zeros((1, hidden), jnp.float32),
        "w_cls_img": scale * jax.random.normal(ks[3], (img_dim, vocab), jnp.float32),
        "w_cls_txt": scale * jax.random.normal(ks[4], (hidden, vocab), jnp.float32),
        "b_cls": scale * jax.random.normal(ks[5], (1, vocab), jnp.float32),
    }


# ----------------------------------------------------------------------------
# Pure-JAX reference (same bf16-operand / f32-accumulate precision regime).
# ----------------------------------------------------------------------------
def vqa_forward_ref(params, images, question):
    bf16 = jnp.bfloat16
    B = images.shape[0]
    img_flat = images.reshape(B, -1).astype(bf16)
    image_features = jnp.maximum(
        jnp.dot(img_flat, params["w_resnet"].astype(bf16),
                preferred_element_type=jnp.float32) + params["b_resnet"], 0.0)
    emb = params["embedding"][question].astype(bf16)
    text_features = jnp.tanh(
        jnp.dot(emb, params["w_gpt2"].astype(bf16),
                preferred_element_type=jnp.float32) + params["b_gpt2"])
    T = text_features.shape[1]
    img_exp = jnp.broadcast_to(
        image_features[:, None, :], (B, T, image_features.shape[-1])).astype(bf16)
    out = (jnp.dot(img_exp, params["w_cls_img"].astype(bf16),
                   preferred_element_type=jnp.float32)
           + jnp.dot(text_features.astype(bf16), params["w_cls_txt"].astype(bf16),
                     preferred_element_type=jnp.float32)
           + params["b_cls"])
    return out


if __name__ == "__main__":
    # Small shapes consistent with the module: B images (NCHW), B x T token ids.
    # T and VOCAB deliberately non-multiples of 8 / 128 to exercise the padding path.
    B, C, HW = 2, 3, 16
    T = 7              # question sequence length
    HIDDEN = 32        # stands in for GPT2 hidden_size (768)
    IMG_DIM = 64       # stands in for the ResNet50 1000-dim output
    VOCAB = 100        # vocab_size

    key = jax.random.PRNGKey(0)
    k_img, k_q, k_p = jax.random.split(key, 3)

    images = jax.random.normal(k_img, (B, C, HW, HW), jnp.float32)       # NCHW
    question = jax.random.randint(k_q, (B, T), 0, VOCAB, jnp.int32)
    params = make_params(k_p, C * HW * HW, IMG_DIM, HIDDEN, VOCAB)

    out = jax.block_until_ready(vqa_forward(params, images, question))
    ref = vqa_forward_ref(params, images, question)

    assert out.shape == (B, T, VOCAB)
    assert jnp.allclose(out, ref, atol=2e-3, rtol=2e-3), "mismatch vs reference"
    print("KERNEL_OK")
</pallas_src>

<mosaic_0001>
module attributes {stable_mosaic.version = 11 : i64} {
  func.func @_img_branch_kernel(%arg0: i32, %arg1: memref<8x768xbf16, #tpu.memory_space<vmem>>, %arg2: memref<768x128xbf16, #tpu.memory_space<vmem>>, %arg3: memref<1x128xf32, #tpu.memory_space<vmem>>, %arg4: memref<128x128xbf16, #tpu.memory_space<vmem>>, %arg5: memref<1x128xf32, #tpu.memory_space<vmem>>, %arg6: memref<8x128xf32, #tpu.memory_space<vmem>>, %arg7: memref<8x128xbf16, #tpu.memory_space<vmem>>) attributes {dimension_semantics = [#tpu.dimension_semantics<arbitrary>], iteration_bounds = array<i64: 1>, scalar_prefetch = 0 : i64, scratch_operands = 1 : i64, tpu.core_type = #tpu.core_type<tc>, window_params = [{pipeline_mode = #tpu.pipeline_mode<synchronous>, transform_indices = @transform_0, window_bounds = array<i64: 8, 768>}, {pipeline_mode = #tpu.pipeline_mode<synchronous>, transform_indices = @transform_1, window_bounds = array<i64: 768, 128>}, {pipeline_mode = #tpu.pipeline_mode<synchronous>, transform_indices = @transform_2, window_bounds = array<i64: 1, 128>}, {transform_indices = @transform_3, window_bounds = array<i64: 128, 128>}, {transform_indices = @transform_4, window_bounds = array<i64: 1, 128>}, {transform_indices = @transform_5, window_bounds = array<i64: 8, 128>}]} {
    %c0_i32 = arith.constant 0 : i32
    %0 = arith.cmpi eq, %arg0, %c0_i32 : i32
    %1 = arith.extui %0 : i1 to i32
    %c0_i32_0 = arith.constant 0 : i32
    %2 = arith.cmpi ne, %1, %c0_i32_0 : i32
    scf.if %2 {
      %c0_8 = arith.constant 0 : index
      %c0_9 = arith.constant 0 : index
      %10 = vector.load %arg1[%c0_8, %c0_9] : memref<8x768xbf16, #tpu.memory_space<vmem>>, vector<8x768xbf16>
      %c0_10 = arith.constant 0 : index
      %c0_11 = arith.constant 0 : index
      %11 = vector.load %arg2[%c0_10, %c0_11] : memref<768x128xbf16, #tpu.memory_space<vmem>>, vector<768x128xbf16>
      %cst_12 = arith.constant dense<0.000000e+00> : vector<8x128xf32>
      %12 = tpu.matmul %10, %11, %cst_12 {dimension_numbers = #tpu.dot_dimension_numbers<[1], [0], [0], [1], [0, 0, 1, 1], [], []>} : vector<8x768xbf16>, vector<768x128xbf16>, vector<8x128xf32> -> vector<8x128xf32>
      %c0_13 = arith.constant 0 : index
      %c0_14 = arith.constant 0 : index
      %13 = vector.load %arg3[%c0_13, %c0_14] : memref<1x128xf32, #tpu.memory_space<vmem>>, vector<1x128xf32>
      %14 = vector.broadcast %13 : vector<1x128xf32> to vector<8x128xf32>
      %15 = arith.addf %12, %14 : vector<8x128xf32>
      %cst_15 = arith.constant 0.000000e+00 : f32
      %16 = vector.broadcast %cst_15 : f32 to vector<8x128xf32>
      %17 = arith.maximumf %15, %16 : vector<8x128xf32>
      %18 = arith.truncf %17 : vector<8x128xf32> to vector<8x128xbf16>
      %c0_16 = arith.constant 0 : index
      %c0_17 = arith.constant 0 : index
      %19 = vector.load %arg7[%c0_16, %c0_17] : memref<8x128xbf16, #tpu.memory_space<vmem>>, vector<8x128xbf16>
      tpu.vector_store %arg7[%c0_16, %c0_17], %18 {strides = array<i32>} : memref<8x128xbf16, #tpu.memory_space<vmem>>, vector<8x128xbf16>,
    } else {
    }
    %c0 = arith.constant 0 : index
    %c0_1 = arith.constant 0 : index
    %3 = vector.load %arg7[%c0, %c0_1] : memref<8x128xbf16, #tpu.memory_space<vmem>>, vector<8x128xbf16>
    %c0_2 = arith.constant 0 : index
    %c0_3 = arith.constant 0 : index
    %4 = vector.load %arg4[%c0_2, %c0_3] : memref<128x128xbf16, #tpu.memory_space<vmem>>, vector<128x128xbf16>
    %cst = arith.constant dense<0.000000e+00> : vector<8x128xf32>
    %5 = tpu.matmul %3, %4, %cst {dimension_numbers = #tpu.dot_dimension_numbers<[1], [0], [0], [1], [0, 0, 1, 1], [], []>} : vector<8x128xbf16>, vector<128x128xbf16>, vector<8x128xf32> -> vector<8x128xf32>
    %c0_4 = arith.constant 0 : index
    %c0_5 = arith.constant 0 : index
    %6 = vector.load %arg5[%c0_4, %c0_5] : memref<1x128xf32, #tpu.memory_space<vmem>>, vector<1x128xf32>
    %7 = vector.broadcast %6 : vector<1x128xf32> to vector<8x128xf32>
    %8 = arith.addf %5, %7 : vector<8x128xf32>
    %c0_6 = arith.constant 0 : index
    %c0_7 = arith.constant 0 : index
    %9 = vector.load %arg6[%c0_6, %c0_7] : memref<8x128xf32, #tpu.memory_space<vmem>>, vector<8x128xf32>
    tpu.vector_store %arg6[%c0_6, %c0_7], %8 {strides = array<i32>} : memref<8x128xf32, #tpu.memory_space<vmem>>, vector<8x128xf32>,
    return
  }
  func.func @transform_0(%arg0: i32) -> (i32, i32) {
    %c0_i32 = arith.constant 0 : i32
    %c0_i32_0 = arith.constant 0 : i32
    %c0_i32_1 = arith.constant 0 : i32
    return %c0_i32, %c0_i32_0 : i32, i32
  }
  func.func @transform_1(%arg0: i32) -> (i32, i32) {
    %c0_i32 = arith.constant 0 : i32
    %c0_i32_0 = arith.constant 0 : i32
    %c0_i32_1 = arith.constant 0 : i32
    return %c0_i32, %c0_i32_0 : i32, i32
  }
  func.func @transform_2(%arg0: i32) -> (i32, i32) {
    %c0_i32 = arith.constant 0 : i32
    %c0_i32_0 = arith.constant 0 : i32
    %c0_i32_1 = arith.constant 0 : i32
    return %c0_i32, %c0_i32_0 : i32, i32
  }
  func.func @transform_3(%arg0: i32) -> (i32, i32) {
    %c0_i32 = arith.constant 0 : i32
    %c0_i32_0 = arith.constant 0 : i32
    return %c0_i32, %arg0 : i32, i32
  }
  func.func @transform_4(%arg0: i32) -> (i32, i32) {
    %c0_i32 = arith.constant 0 : i32
    %c0_i32_0 = arith.constant 0 : i32
    return %c0_i32, %arg0 : i32, i32
  }
  func.func @transform_5(%arg0: i32) -> (i32, i32) {
    %c0_i32 = arith.constant 0 : i32
    %c0_i32_0 = arith.constant 0 : i32
    return %c0_i32, %arg0 : i32, i32
  }
}

</mosaic_0001>

<bundles_post_ra>
// kernel: tpu_custom_call.1
= control target key start
LH: loop header
LB: loop body
LE: loop exit
PB: predicated region body
PF: predicated region fallthrough
CT: control target
= control target key end

     0   :  { %10 = vsyncpa [#allocation4], 0  ;;  %s1153_s0 = inlined_call_operand.hbm [shape: bf16[8,768], index: 0, kind: input, shape index: {}]   ;;  %s1154_s1 = inlined_call_operand.hbm [shape: bf16[768,128], index: 1, kind: input, shape index: {}]   ;;  %s1155_s2 = inlined_call_operand.vmem [shape: f32[1,128], index: 2, kind: input, shape index: {}]   ;;  %s1156_s3 = inlined_call_operand.hbm [shape: bf16[128,128], index: 3, kind: input, shape index: {}]   ;;  %s1157_s4 = inlined_call_operand.vmem [shape: f32[1,128], index: 4, kind: input, shape index: {}]   ;;  %s1158_s5 = inlined_call_operand.hbm [shape: f32[8,128], index: 5, kind: output, shape index: {}]  }
   0x1   :  { %11 = vsyncpa [#allocation7], 0 }
   0x2   :  { %12 = vsyncpa [#allocation5], 0  ;;  %s1055_s18 = smov [#allocation6]   ;;  %s961_s22 = scalar_lea.hbm %s1154_s1, 6144 }
   0x3   :  { %s28_s19 = sshll.u32 %s1055_s18, 4  ;;  %p962_p0 = scmp.ne.s32.totalorder %s1154_s1, %s961_s22  ;;  %s29_s19 = int_to_ptr.vmem [resolvable:$true] %s28_s19 }
   0x4   :  { %p965_p1 = scmp.lt.u32.totalorder %s961_s22, %s1154_s1 }
   0x6   :  { %p967_p2 = pnand %p965_p1, %p962_p0 }
   0x8   :  { %970 = shalt.err (!%p967_p2)
}
   0x9   :  { %s971_s27 = scalar_lea.vmem %s29_s19, 6144  ;;  %p976_p4 = scmp.lt.s32.totalorder %s29_s19, %s29_s19 }
   0xa   :  { %p972_p3 = scmp.ne.s32.totalorder %s29_s19, %s971_s27  ;;  %p977_p5 = scmp.lt.s32.totalorder %s971_s27, %s971_s27 }
   0xc   :  { %p978_p6 = por %p977_p5, %p976_p4 }
   0xe   :  { %p979_p7 = pnand %p978_p6, %p972_p3 }
  0x10   :  { %982 = shalt.err (!%p979_p7)
}
  0x11   :  { %s1056_s28 = smov 64   ;;  %s1057_s29 = smov 4  }
  0x12   :  { %34 = dma.hbm_to_vmem [thread:$0]  %s1154_s1, 6144, %s29_s19, [#allocation7], %s1056_s28, %s1056_s28, %s1057_s29  }
  0x13   :  { %s1058_s7 = smov [#allocation3]   ;;  %s1059_s9 = smov [#allocation8]  }
  0x14   :  { %s19_s8 = sshll.u32 %s1058_s7, 4  ;;  %s42_s10 = sshll.u32 %s1059_s9, 4  ;;  %s20_s8 = int_to_ptr.vmem [resolvable:$true] %s19_s8  ;;  %s43_s10 = int_to_ptr.vmem [resolvable:$true] %s42_s10 }
  0x15   :  { %s983_s13 = scalar_lea.hbm %s1153_s0, 384 }
  0x16   :  { %p984_p8 = scmp.ne.s32.totalorder %s1153_s0, %s983_s13  ;;  %p987_p9 = scmp.lt.u32.totalorder %s983_s13, %s1153_s0 }
  0x18   :  { %p989_p10 = pnand %p987_p9, %p984_p8 }
  0x1a   :  { %992 = shalt.err (!%p989_p10)
}
  0x1b   :  { %s993_s1 = scalar_lea.vmem %s20_s8, 384  ;;  %p998_p12 = scmp.lt.s32.totalorder %s20_s8, %s20_s8 }
  0x1c   :  { %p994_p11 = scmp.ne.s32.totalorder %s20_s8, %s993_s1  ;;  %p999_p13 = scmp.lt.s32.totalorder %s993_s1, %s993_s1 }
  0x1e   :  { %p1000_p0 = por %p999_p13, %p998_p12 }
  0x20   :  { %p1001_p1 = pnand %p1000_p0, %p994_p11 }
  0x22   :  { %1004 = shalt.err (!%p1001_p1)
}
  0x23   :  { %22 = dma.hbm_to_vmem [thread:$0]  %s1153_s0, 384, %s20_s8, [#allocation4]  }
  0x24   :  { %s1005_s22 = scalar_lea.hbm %s1156_s3, 1024 }
  0x25   :  { %p1006_p2 = scmp.ne.s32.totalorder %s1156_s3, %s1005_s22  ;;  %p1009_p3 = scmp.lt.u32.totalorder %s1005_s22, %s1156_s3 }
  0x27   :  { %p1011_p4 = pnand %p1009_p3, %p1006_p2 }
  0x29   :  { %1014 = shalt.err (!%p1011_p4)
}
  0x2a   :  { %s1015_s27 = scalar_lea.vmem %s43_s10, 1024  ;;  %p1020_p6 = scmp.lt.s32.totalorder %s43_s10, %s43_s10 }
  0x2b   :  { %p1016_p5 = scmp.ne.s32.totalorder %s43_s10, %s1015_s27  ;;  %p1021_p7 = scmp.lt.s32.totalorder %s1015_s27, %s1015_s27 }
  0x2d   :  { %p1022_p8 = por %p1021_p7, %p1020_p6 }
  0x2f   :  { %p1023_p9 = pnand %p1022_p8, %p1016_p5 }
  0x31   :  { %1026 = shalt.err (!%p1023_p9)
}
  0x32   :  { %48 = dma.hbm_to_vmem [thread:$0]  %s1156_s3, 1024, %s43_s10, [#allocation7], %s1056_s28, %s1056_s28, %s1057_s29  }
  0x33   :  { %1049 = dma.done.wait [#allocation4], 384  }
  0x34   :  { %1050 = vsyncadd [#allocation4], 4294966912 }
  0x35   :  { %1051 = dma.done.wait [#allocation7], 7168  }
  0x36   :  { %1052 = vsyncadd [#allocation7], 4294960128  ;;  %v899_v0 = vld [vmem:[#allocation6 + $0x40] sm:$0xff]   ;;  %v903_v4 = vld [vmem:[#allocation6 + $0x48] sm:$0xff]   ;;  %v1060_v58 = vmov 0.0   ;;  %vm1061_vm0 = vmmov 0  }
  0x37   :  { %v900_v1 = vld [vmem:[#allocation6] sm:$0xff]   ;;  %796 = vmatprep.subr.bf16.mxu0 %v899_v0  ;;  %v904_v5 = vld [vmem:[#allocation6 + $0x8] sm:$0xff]   ;;  %v907_v8 = vld [vmem:[#allocation6 + $0x50] sm:$0xff]   ;;  %s1062_s6 = smov [#allocation9]  }
  0x38   :  { %v901_v2 = vld [vmem:[#allocation6 + $0xc0] sm:$0xff]   ;;  %797 = vmatpush3.bf16.msra.mxu0 %v900_v1  ;;  %v905_v6 = vld [vmem:[#allocation6 + $0xc8] sm:$0xff]   ;;  %v908_v9 = vld [vmem:[#allocation6 + $0x10] sm:$0xff]   ;;  %s722_s7 = sshll.u32 %s1062_s6, 4  ;;  %s723_s7 = int_to_ptr.vmem [resolvable:$true] %s722_s7 }
  0x39   :  { %v902_v3 = vld [vmem:[#allocation6 + $0x80] sm:$0xff]   ;;  %818 = vmatprep.subr.bf16.mxu1 %v901_v2  ;;  %798 = vmatprep.subr.bf16.mxu0 %v903_v4  ;;  %v906_v7 = vld [vmem:[#allocation6 + $0x88] sm:$0xff]   ;;  %v909_v10 = vld [vmem:[#allocation6 + $0xd0] sm:$0xff]   ;;  %s1027_s8 = scalar_lea.vmem %s723_s7, 128  ;;  %p1032_p11 = scmp.lt.s32.totalorder %s723_s7, %s723_s7 }
  0x3a   :  { %819 = vmatpush3.bf16.msra.mxu1 %v902_v3  ;;  %v910_v11 = vld [vmem:[#allocation6 + $0x90] sm:$0xff]   ;;  %v911_v12 = vld [vmem:[#allocation6 + $0x58] sm:$0xff]   ;;  %v915_v16 = vld [vmem:[#allocation6 + $0x60] sm:$0xff]   ;;  %p1028_p10 = scmp.ne.s32.totalorder %s723_s7, %s1027_s8  ;;  %p1033_p12 = scmp.lt.s32.totalorder %s1027_s8, %s1027_s8 }
  0x3b   :  { %820 = vmatprep.subr.bf16.mxu1 %v905_v6  ;;  %v912_v13 = vld [vmem:[#allocation6 + $0x18] sm:$0xff]   ;;  %v916_v17 = vld [vmem:[#allocation6 + $0x20] sm:$0xff]   ;;  %v919_v20 = vld [vmem:[#allocation6 + $0x68] sm:$0xff]  }
  0x3c   :  { %799 = vmatpush3.bf16.msra.mxu0 %v904_v5  ;;  %v913_v14 = vld [vmem:[#allocation6 + $0xd8] sm:$0xff]   ;;  %v917_v18 = vld [vmem:[#allocation6 + $0xe0] sm:$0xff]   ;;  %v920_v21 = vld [vmem:[#allocation6 + $0x28] sm:$0xff]   ;;  %p1034_p13 = por %p1033_p12, %p1032_p11 }
  0x3d   :  { %800 = vmatprep.subr.bf16.mxu0 %v907_v8  ;;  %v914_v15 = vld [vmem:[#allocation6 + $0x98] sm:$0xff]   ;;  %v918_v19 = vld [vmem:[#allocation6 + $0xa0] sm:$0xff]   ;;  %v921_v22 = vld [vmem:[#allocation6 + $0xe8] sm:$0xff]  }
  0x3e   :  { %821 = vmatpush3.bf16.msra.mxu1 %v906_v7  ;;  %v922_v23 = vld [vmem:[#allocation6 + $0xa8] sm:$0xff]   ;;  %v923_v24 = vld [vmem:[#allocation6 + $0x70] sm:$0xff]   ;;  %v927_v28 = vld [vmem:[#allocation6 + $0x78] sm:$0xff]   ;;  %p1035_p0 = pnand %p1034_p13, %p1028_p10 }
  0x3f   :  { %822 = vmatprep.subr.bf16.mxu1 %v909_v10  ;;  %v924_v25 = vld [vmem:[#allocation6 + $0x30] sm:$0xff]   ;;  %v928_v29 = vld [vmem:[#allocation6 + $0x38] sm:$0xff]   ;;  %v65_v31 = vld [vmem:[#allocation3] sm:$0xff] }
  0x40   :  { %801 = vmatpush3.bf16.msra.mxu0 %v908_v9  ;;  %v925_v26 = vld [vmem:[#allocation6 + $0xf0] sm:$0xff]   ;;  %v929_v30 = vld [vmem:[#allocation6 + $0xf8] sm:$0xff]   ;;  %v733_v32 = vcombine.low %v65_v31, %v65_v31  ;;  %v734_v33 = vcombine.high %v65_v31, %v65_v31  ;;  %v933_v35 = vld [vmem:[#allocation6 + $0x140] sm:$0xff]  }
  0x41   :  { %802 = vmatprep.subr.bf16.mxu0 %v911_v12  ;;  %v926_v27 = vld [vmem:[#allocation6 + $0xb0] sm:$0xff]   ;;  %v932_v34 = vld [vmem:[#allocation6 + $0xb8] sm:$0xff]   ;;  %v936_v39 = vld [vmem:[#allocation6 + $0x100] sm:$0xff]  }
  0x42   :  { %823 = vmatpush3.bf16.msra.mxu1 %v910_v11  ;;  %v66_v36 = vld [vmem:[#allocation3 + $0x8] sm:$0xff]  ;;  %512 = vmatprep.mubr.bf16.mxu0 %v734_v33  ;;  %v937_v40 = vld [vmem:[#allocation6 + $0x148] sm:$0xff]   ;;  %v941_v44 = vld [vmem:[#allocation6 + $0x158] sm:$0xff]  }
  0x43   :  { %824 = vmatprep.subr.bf16.mxu1 %v913_v14  ;;  %v735_v37 = vcombine.low %v66_v36, %v66_v36  ;;  %v736_v38 = vcombine.high %v66_v36, %v66_v36  ;;  %v938_v41 = vld [vmem:[#allocation6 + $0x108] sm:$0xff]   ;;  %v939_v42 = vld [vmem:[#allocation6 + $0x150] sm:$0xff]   ;;  %v942_v45 = vld [vmem:[#allocation6 + $0x118] sm:$0xff]  }
  0x44   :  { %803 = vmatpush3.bf16.msra.mxu0 %v912_v13  ;;  %v940_v43 = vld [vmem:[#allocation6 + $0x110] sm:$0xff]   ;;  %v943_v46 = vld [vmem:[#allocation6 + $0x160] sm:$0xff]   ;;  %v945_v48 = vld [vmem:[#allocation6 + $0x168] sm:$0xff]  }
  0x45   :  { %804 = vmatprep.subr.bf16.mxu0 %v915_v16  ;;  %552 = vmatprep.mubr.bf16.mxu1 %v736_v38  ;;  %v944_v47 = vld [vmem:[#allocation6 + $0x120] sm:$0xff]   ;;  %v67_v49 = vld [vmem:[#allocation3 + $0x10] sm:$0xff]  ;;  %v946_v51 = vld [vmem:[#allocation6 + $0x128] sm:$0xff]  }
  0x46   :  { %825 = vmatpush3.bf16.msra.mxu1 %v914_v15  ;;  %v738_v50 = vcombine.high %v67_v49, %v67_v49  ;;  %v947_v52 = vld [vmem:[#allocation6 + $0x170] sm:$0xff]   ;;  %v949_v54 = vld [vmem:[#allocation6 + $0x178] sm:$0xff]   ;;  %v737_v56 = vcombine.low %v67_v49, %v67_v49  ;;  %v953_v57 = vld [vmem:[#allocation8] sm:$0xff]  }
  0x47   :  { %826 = vmatprep.subr.bf16.mxu1 %v917_v18  ;;  %v948_v53 = vld [vmem:[#allocation6 + $0x130] sm:$0xff]   ;;  %v950_v55 = vld [vmem:[#allocation6 + $0x138] sm:$0xff]   ;;  %v954_v59 = vld [vmem:[#allocation8 + $0x8] sm:$0xff]  }
  0x48   :  { %805 = vmatpush3.bf16.msra.mxu0 %v916_v17  ;;  %v955_v60 = vld [vmem:[#allocation8 + $0x10] sm:$0xff]   ;;  %v956_v61 = vld [vmem:[#allocation8 + $0x18] sm:$0xff]   ;;  %v957_v62 = vld [vmem:[#allocation8 + $0x20] sm:$0xff]  }
  0x49   :  { %806 = vmatprep.subr.bf16.mxu0 %v919_v20  ;;  %v958_v63 = vld [vmem:[#allocation8 + $0x28] sm:$0xff]   ;;  %v959_v0 = vld [vmem:[#allocation8 + $0x30] sm:$0xff]   ;;  %v960_v1 = vld [vmem:[#allocation8 + $0x38] sm:$0xff]  }
  0x4a   :  { %827 = vmatpush3.bf16.msra.mxu1 %v918_v19  ;;  %v732_v3 = vld [vmem:[%s1155_s2] ss:$0 sm:$0xff] }
  0x4b   :  { %828 = vmatprep.subr.bf16.mxu1 %v921_v22 }
  0x4c   :  { %807 = vmatpush3.bf16.msra.mxu0 %v920_v21 }
  0x4d   :  { %808 = vmatprep.subr.bf16.mxu0 %v923_v24  ;;  %v787_v24 = vld [vmem:[%s1157_s4] ss:$0 sm:$0xff] }
  0x4e   :  { %829 = vmatpush3.bf16.msra.mxu1 %v922_v23 }
  0x4f   :  { %830 = vmatprep.subr.bf16.mxu1 %v925_v26 }
  0x50   :  { %809 = vmatpush3.bf16.msra.mxu0 %v924_v25 }
  0x51   :  { %810 = vmatprep.subr.bf16.mxu0 %v927_v28 }
  0x52   :  { %831 = vmatpush3.bf16.msra.mxu1 %v926_v27 }
  0x53   :  { %832 = vmatprep.subr.bf16.mxu1 %v929_v30 }
  0x54   :  { %811 = vmatpush3.bf16.msra.mxu0 %v928_v29 }
  0x55   :  { %840 = vmatprep.subr.bf16.mxu0 %v933_v35 }
  0x56   :  { %833 = vmatpush3.bf16.msra.mxu1 %v932_v34 }
  0x57   :  { %513 = vmatmul.mubr.bf16.vlgmr.msra.gmra.mrb[0].mxu0 %v733_v32  ;;  %871 = vmatprep.subr.bf16.mxu1 %v1060_v58 }
  0x58   :  { %841 = vmatpush3.bf16.msra.mxu0 %v936_v39  ;;  %592 = vmatprep.mubr.bf16.mxu0 %v738_v50 }
  0x59   :  { %553 = vmatmul.mubr.bf16.vlgmr.msra.gmra.mrb[0].mxu1 %v735_v37  ;;  %842 = vmatprep.subr.bf16.mxu0 %v937_v40 }
  0x5a   :  { %872 = vmatpush3.bf16.msra.mxu1 %v953_v57  ;;  %887 = vmatprep.mubr.msk.bf16.mxu1 %vm1061_vm0, %v1060_v58 }
  0x5b   :  { %873 = vmatprep.subr.bf16.mxu1 %v1060_v58 }
  0x5c   :  { %843 = vmatpush3.bf16.msra.mxu0 %v938_v41 }
  0x5d   :  { %844 = vmatprep.subr.bf16.mxu0 %v939_v42 }
  0x5e   :  { %874 = vmatpush3.bf16.msra.mxu1 %v954_v59 }
  0x5f   :  { %875 = vmatprep.subr.bf16.mxu1 %v1060_v58 }
  0x60   :  { %845 = vmatpush3.bf16.msra.mxu0 %v940_v43 }
  0x61   :  { %846 = vmatprep.subr.bf16.mxu0 %v941_v44 }
  0x62   :  { %876 = vmatpush3.bf16.msra.mxu1 %v955_v60 }
  0x63   :  { %877 = vmatprep.subr.bf16.mxu1 %v1060_v58 }
  0x64   :  { %847 = vmatpush3.bf16.msra.mxu0 %v942_v45 }
  0x65   :  { %848 = vmatprep.subr.bf16.mxu0 %v943_v46 }
  0x66   :  { %878 = vmatpush3.bf16.msra.mxu1 %v956_v61 }
  0x67   :  { %879 = vmatprep.subr.bf16.mxu1 %v1060_v58 }
  0x68   :  { %849 = vmatpush3.bf16.msra.mxu0 %v944_v47 }
  0x69   :  { %850 = vmatprep.subr.bf16.mxu0 %v945_v48 }
  0x6a   :  { %880 = vmatpush3.bf16.msra.mxu1 %v957_v62 }
  0x6b   :  { %881 = vmatprep.subr.bf16.mxu1 %v1060_v58 }
  0x6c   :  { %851 = vmatpush3.bf16.msra.mxu0 %v946_v51 }
  0x6d   :  { %852 = vmatprep.subr.bf16.mxu0 %v947_v52 }
  0x6e   :  { %882 = vmatpush3.bf16.msra.mxu1 %v958_v63 }
  0x6f   :  { %883 = vmatprep.subr.bf16.mxu1 %v1060_v58 }
  0x70   :  { %853 = vmatpush3.bf16.msra.mxu0 %v948_v53 }
  0x71   :  { %854 = vmatprep.subr.bf16.mxu0 %v949_v54 }
  0x72   :  { %884 = vmatpush3.bf16.msra.mxu1 %v959_v0 }
  0x73   :  { %885 = vmatprep.subr.bf16.mxu1 %v1060_v58 }
  0x74   :  { %855 = vmatpush3.bf16.msra.mxu0 %v950_v55 }
  0x76   :  { %886 = vmatpush3.bf16.msra.mxu1 %v960_v1 }
  0x77   :  { %593 = vmatmul.mubr.bf16.vlgmr.msra.gmra.mrb[4].mxu0 %v737_v56 }
 0x12a   :  { %v812_v2 = vpop.f32.mrb[0].mxu0 }
 0x12b   :  { %v813_v4 = vpop.f32.mrb[1].mxu0 }
 0x12c   :  { %v814_v5 = vadd.f32 %v813_v4, %v812_v2  ;;  %v815_v6 = vpop.f32.mrb[2].mxu0  ;;  %v834_v7 = vpop.f32.mrb[0].mxu1 }
 0x12d   :  { %v816_v8 = vpop.f32.mrb[3].mxu0  ;;  %v835_v9 = vpop.f32.mrb[1].mxu1 }
 0x12e   :  { %v515_v10 = vadd.f32 %v814_v5, %v732_v3  ;;  %v836_v11 = vadd.f32 %v835_v9, %v834_v7  ;;  %v837_v12 = vpop.f32.mrb[2].mxu1 }
 0x12f   :  { %v838_v13 = vpop.f32.mrb[3].mxu1 }
 0x130   :  { %v555_v14 = vadd.f32 %v836_v11, %v515_v10 }
 0x14a   :  { %v856_v15 = vpop.f32.mrb[4].mxu0 }
 0x14b   :  { %v857_v16 = vpop.f32.mrb[5].mxu0 }
 0x14c   :  { %v858_v17 = vadd.f32 %v857_v16, %v856_v15  ;;  %v859_v18 = vpop.f32.mrb[6].mxu0 }
 0x14d   :  { %v860_v19 = vpop.f32.mrb[7].mxu0 }
 0x14e   :  { %v595_v20 = vadd.f32 %v858_v17, %v555_v14 }
 0x150   :  { %v600_v21 = vmax.f32 %v595_v20, 0.0 }
 0x152   :  { %v601_v22 = vpack.c.bf16 %v600_v21, %v600_v21 }
 0x154   :  { %602 = vst [vmem:[#allocation2] sm:$0xf] %v601_v22 }
 0x15b   :  { %v603_v23 = vld [vmem:[#allocation2] sm:$0xf] }
 0x15c   :  { %888 = vmatmul.mubr.bf16.vlgmr.msra.gmra.mrb[4].mxu1 %v603_v23 }
 0x22f   :  { %v709_v25 = vpop.f32.mrb[4].mxu1 }
 0x230   :  { %v710_v26 = vadd.f32 %v787_v24, %v709_v25  ;;  %v889_v27 = vpop.f32.mrb[5].mxu1 }
 0x231   :  { %v712_v28 = vpop.f32.mrb[6].mxu1 }
 0x232   :  { %715 = vst [vmem:[#allocation9] sm:$0xff] %v710_v26  ;;  %v890_v29 = vpop.f32.mrb[7].mxu1 }
 0x233   :  { %1038 = shalt.err (!%p1035_p0)
}
 0x234   :  { %s1039_s4 = scalar_lea.hbm %s1158_s5, 128 }
 0x235   :  { %p1040_p1 = scmp.ne.s32.totalorder %s1158_s5, %s1039_s4  ;;  %p1043_p2 = scmp.lt.u32.totalorder %s1039_s4, %s1158_s5 }
 0x237   :  { %p1045_p3 = pnand %p1043_p2, %p1040_p1 }
 0x239   :  { %1048 = shalt.err (!%p1045_p3)
}
 0x23a   :  { %725 = dma.vmem_to_hbm [thread:$0]  %s723_s7, 128, %s1158_s5, [#allocation5]  }
 0x23b   :  { %1053 = dma.done.wait [#allocation5], 128  }
 0x23c   :  { %1054 = vsyncadd [#allocation5], 4294967168 }
 0x23d   :  { %729 = vsyncpa [#allocation4], 1 }
 0x23e   :  { %730 = vsyncpa [#allocation7], 1 }
 0x23f   :  { %731 = vsyncpa [#allocation5], 1 }

</bundles_post_ra>
